<compile_context>
chip_gen: v7x
topology: tpu7x:2x2x1
jax: 0.10.0
libtpu: 0.0.40
codegen_flags: <defaults>
</compile_context>

<pallas_src>
import functools

import jax
import jax.numpy as jnp
from jax.experimental import pallas as pl
from jax.experimental.pallas import tpu as pltpu


def _gru_fc_kernel(x_ref, wx_ref, wh_ref, b_ref, wfc_ref, bfc_ref, y_ref,
                   gx_ref, hout_ref, *, T, N, Np, H):
    """Fused GRU recurrence + Linear head, single invocation.

    x_ref   : (T*Np, I)   inputs; row t*Np+f == seq[t, f, :] (f >= N is zero pad)
    wx_ref  : (I, 4H)     fused input->hidden weights  [r | z | n_ih | 0   ]
    wh_ref  : (H, 4H)     fused hidden->hidden weights [r | z | 0    | n_hh]
    b_ref   : (1, 4H)     pre-folded biases [bir+bhr | biz+bhz | bin | bhn]
    wfc_ref : (N*H, O)    Linear weight (transposed), feature-major rows
    bfc_ref : (1, O)      Linear bias
    y_ref   : (T, O)      output (the kernel's only HBM write)
    gx_ref  : (T*Np, 4H)  VMEM scratch: x-side preactivations for all steps
    hout_ref: (T*Np, H)   VMEM scratch: hidden-state history, row t*Np+f == h_t[f]
    """
    # One batched MXU matmul covers the x contribution of ALL time steps; the
    # biases are folded in here once (hoisted off the serial chain).
    gx_ref[...] = (
        jnp.dot(x_ref[...], wx_ref[...], preferred_element_type=jnp.float32)
        + b_ref[...])
    # Hoist wh once for the whole recurrence.  (On v5e this could additionally
    # be made weight-stationary via pltpu.matmul_push_rhs/acc_lhs/pop.)
    wh = wh_ref[...]

    def step(t, h_prev):
        row = pl.multiple_of(t * Np, Np)      # Np % 8 == 0 -> sublane-aligned
        # Single (Np, H) x (H, 4H) matmul gives every gate's h contribution.
        pre = gx_ref[pl.ds(row, Np), :] + jnp.dot(
            h_prev, wh, preferred_element_type=jnp.float32)
        rz = jax.nn.sigmoid(pre[:, :2 * H])   # r|z in one 2H-wide sigmoid
        r = rz[:, :H]
        z = rz[:, H:]
        n = jnp.tanh(pre[:, 2 * H:3 * H] + r * pre[:, 3 * H:])
        h_new = (1.0 - z) * n + z * h_prev
        hout_ref[pl.ds(row, Np), :] = h_new   # stays in VMEM; never hits HBM
        return h_new

    # Hidden state is the (register-resident) loop carry, not a VMEM scratch;
    # unroll=True gives the LLO scheduler cross-iteration visibility.
    jax.lax.fori_loop(0, T, step, jnp.zeros((Np, H), jnp.float32), unroll=True)

    # FC epilogue, off the serial chain:  y[t] = bfc + sum_f h_t[f] @ Wfc_f.
    # Strided ref loads (row stride Np) pick feature f for every t, avoiding any
    # in-kernel (T*Np, H) -> (T, Np*H) reshape/relayout.  Padded features (f >= N)
    # are simply never read.
    acc = jnp.zeros(y_ref.shape, jnp.float32)
    for f in range(N):                         # static, small (num_features)
        acc = acc + jnp.dot(
            hout_ref[pl.ds(f, T, stride=Np), :],
            wfc_ref[pl.ds(f * H, H), :],
            preferred_element_type=jnp.float32)
    y_ref[...] = (acc + bfc_ref[...]).astype(y_ref.dtype)


def my_gru_forward(x, params):
    """x: (T, N, I) float32 -> (T, O) float32.

    T = original batch (GRU time axis), N = num_features (GRU batch axis),
    I = max_len (GRU input size), H = embedding_dim, O = outlen.
    """
    wx, wh, b, wfc, bfc = params
    T, N, I = x.shape
    H = wh.shape[0]
    O = bfc.shape[-1]

    # Pad the feature (GRU-batch) axis to a multiple of 8 (f32 sublane count)
    # so every per-step row slice inside the kernel is sublane-aligned.
    Np = ((N + 7) // 8) * 8
    if Np != N:
        x = jnp.pad(x, ((0, 0), (0, Np - N), (0, 0)))
    x2d = x.reshape(T * Np, I)

    y = pl.pallas_call(
        functools.partial(_gru_fc_kernel, T=T, N=N, Np=Np, H=H),
        out_shape=jax.ShapeDtypeStruct((T, O), jnp.float32),
        scratch_shapes=[
            pltpu.VMEM((T * Np, 4 * H), jnp.float32),   # x-side preactivations
            pltpu.VMEM((T * Np, H), jnp.float32),       # hidden-state history
        ],
        compiler_params=pltpu.CompilerParams(
            vmem_limit_bytes=32 * 1024 * 1024),
    )(x2d, wx, wh, b, wfc, bfc)
    return y


def prepare_params(w_ih, w_hh, b_ih, b_hh, w_fc, b_fc):
    """Convert PyTorch-layout GRU/Linear params to the fused kernel layouts.

    w_ih: (3H, I), w_hh: (3H, H), b_ih/b_hh: (3H,), gate order [r, z, n]
    w_fc: (O, N*H), b_fc: (O,)
    """
    H = w_hh.shape[1]
    I = w_ih.shape[1]
    wir, wiz, win = w_ih[:H].T, w_ih[H:2 * H].T, w_ih[2 * H:].T   # (I, H)
    whr, whz, whn = w_hh[:H].T, w_hh[H:2 * H].T, w_hh[2 * H:].T   # (H, H)
    wx = jnp.concatenate([wir, wiz, win, jnp.zeros((I, H), jnp.float32)], 1)
    wh = jnp.concatenate([whr, whz, jnp.zeros((H, H), jnp.float32), whn], 1)
    bir, biz, bin_ = b_ih[:H], b_ih[H:2 * H], b_ih[2 * H:]
    bhr, bhz, bhn = b_hh[:H], b_hh[H:2 * H], b_hh[2 * H:]
    b = jnp.concatenate([bir + bhr, biz + bhz, bin_, bhn])[None, :]
    return wx, wh, b, w_fc.T, b_fc[None, :]


def ref_forward(x, w_ih, w_hh, b_ih, b_hh, w_fc, b_fc):
    """Pure-JAX reference with the exact PyTorch GRU + Linear semantics."""
    T, N, _ = x.shape
    H = w_hh.shape[1]
    wir, wiz, win = w_ih[:H], w_ih[H:2 * H], w_ih[2 * H:]
    whr, whz, whn = w_hh[:H], w_hh[H:2 * H], w_hh[2 * H:]
    bir, biz, bin_ = b_ih[:H], b_ih[H:2 * H], b_ih[2 * H:]
    bhr, bhz, bhn = b_hh[:H], b_hh[H:2 * H], b_hh[2 * H:]
    h = jnp.zeros((N, H), jnp.float32)
    ys = []
    for t in range(T):
        xt = x[t]
        r = jax.nn.sigmoid(xt @ wir.T + bir + h @ whr.T + bhr)
        z = jax.nn.sigmoid(xt @ wiz.T + biz + h @ whz.T + bhz)
        n = jnp.tanh(xt @ win.T + bin_ + r * (h @ whn.T + bhn))
        h = (1.0 - z) * n + z * h
        ys.append(h.reshape(-1) @ w_fc.T + b_fc)
    return jnp.stack(ys)


if __name__ == "__main__":
    # Scaled-down shapes consistent with the module's forward:
    # T = batch (GRU "seq" axis), N = num_features = 9, I = max_len (GRU input),
    # H = embedding_dim (GRU hidden), O = outlen.
    T, N, I, H, O = 4, 9, 32, 64, 128

    key = jax.random.PRNGKey(0)
    ks = jax.random.split(key, 7)
    kg = float(1.0 / jnp.sqrt(H))
    kf = float(1.0 / jnp.sqrt(N * H))

    # PyTorch-layout parameters (gate order [r, z, n]).
    w_ih = jax.random.uniform(ks[0], (3 * H, I), jnp.float32, -kg, kg)
    w_hh = jax.random.uniform(ks[1], (3 * H, H), jnp.float32, -kg, kg)
    b_ih = jax.random.uniform(ks[2], (3 * H,), jnp.float32, -kg, kg)
    b_hh = jax.random.uniform(ks[3], (3 * H,), jnp.float32, -kg, kg)
    w_fc = jax.random.uniform(ks[4], (O, N * H), jnp.float32, -kf, kf)
    b_fc = jax.random.uniform(ks[5], (O,), jnp.float32, -kf, kf)

    params = prepare_params(w_ih, w_hh, b_ih, b_hh, w_fc, b_fc)
    x = jax.random.normal(ks[6], (T, N, I), jnp.float32)

    y = my_gru_forward(x, params)
    jax.block_until_ready(y)

    y_ref = ref_forward(x, w_ih, w_hh, b_ih, b_hh, w_fc, b_fc)
    assert y.shape == (T, O)
    err = float(jnp.max(jnp.abs(y - y_ref)))
    assert jnp.allclose(y, y_ref, atol=1e-4, rtol=1e-4), err

    print("KERNEL_OK")
</pallas_src>

<mosaic_0001>
module attributes {stable_mosaic.version = 11 : i64} {
  func.func @_gru_fc_kernel(%arg0: memref<64x32xf32, #tpu.memory_space<vmem>>, %arg1: memref<32x256xf32, #tpu.memory_space<vmem>>, %arg2: memref<64x256xf32, #tpu.memory_space<vmem>>, %arg3: memref<1x256xf32, #tpu.memory_space<vmem>>, %arg4: memref<576x128xf32, #tpu.memory_space<vmem>>, %arg5: memref<1x128xf32, #tpu.memory_space<vmem>>, %arg6: memref<4x128xf32, #tpu.memory_space<vmem>>, %arg7: memref<64x256xf32, #tpu.memory_space<vmem>>, %arg8: memref<64x64xf32, #tpu.memory_space<vmem>>) attributes {dimension_semantics = [], scalar_prefetch = 0 : i64, scratch_operands = 2 : i64, tpu.core_type = #tpu.core_type<tc>} {
    %c0 = arith.constant 0 : index
    %c0_0 = arith.constant 0 : index
    %0 = vector.load %arg0[%c0, %c0_0] : memref<64x32xf32, #tpu.memory_space<vmem>>, vector<64x32xf32>
    %c0_1 = arith.constant 0 : index
    %c0_2 = arith.constant 0 : index
    %1 = vector.load %arg1[%c0_1, %c0_2] : memref<32x256xf32, #tpu.memory_space<vmem>>, vector<32x256xf32>
    %cst = arith.constant dense<0.000000e+00> : vector<64x256xf32>
    %2 = tpu.matmul %0, %1, %cst {dimension_numbers = #tpu.dot_dimension_numbers<[1], [0], [0], [1], [0, 0, 1, 1], [], []>} : vector<64x32xf32>, vector<32x256xf32>, vector<64x256xf32> -> vector<64x256xf32>
    %c0_3 = arith.constant 0 : index
    %c0_4 = arith.constant 0 : index
    %3 = vector.load %arg3[%c0_3, %c0_4] : memref<1x256xf32, #tpu.memory_space<vmem>>, vector<1x256xf32>
    %4 = vector.broadcast %3 : vector<1x256xf32> to vector<64x256xf32>
    %5 = arith.addf %2, %4 : vector<64x256xf32>
    %c0_5 = arith.constant 0 : index
    %c0_6 = arith.constant 0 : index
    %6 = vector.load %arg7[%c0_5, %c0_6] : memref<64x256xf32, #tpu.memory_space<vmem>>, vector<64x256xf32>
    tpu.vector_store %arg7[%c0_5, %c0_6], %5 {strides = array<i32>} : memref<64x256xf32, #tpu.memory_space<vmem>>, vector<64x256xf32>,
    %c0_7 = arith.constant 0 : index
    %c0_8 = arith.constant 0 : index
    %7 = vector.load %arg2[%c0_7, %c0_8] : memref<64x256xf32, #tpu.memory_space<vmem>>, vector<64x256xf32>
    %cst_9 = arith.constant 0.000000e+00 : f32
    %8 = vector.broadcast %cst_9 : f32 to vector<16x64xf32>
    %c0_i32 = arith.constant 0 : i32
    %c16_i32 = arith.constant 16 : i32
    %9 = arith.muli %c0_i32, %c16_i32 : i32
    %10 = tpu.assume_multiple %9, 16 : i32
    %11 = arith.index_cast %10 : i32 to index
    %c0_10 = arith.constant 0 : index
    %12 = vector.load %arg7[%11, %c0_10] : memref<64x256xf32, #tpu.memory_space<vmem>>, vector<16x256xf32>
    %cst_11 = arith.constant dense<0.000000e+00> : vector<16x256xf32>
    %13 = tpu.matmul %8, %7, %cst_11 {dimension_numbers = #tpu.dot_dimension_numbers<[1], [0], [0], [1], [0, 0, 1, 1], [], []>} : vector<16x64xf32>, vector<64x256xf32>, vector<16x256xf32> -> vector<16x256xf32>
    %14 = arith.addf %12, %13 : vector<16x256xf32>
    %15 = vector.extract_strided_slice %14 {offsets = [0, 0], sizes = [16, 128], strides = [1, 1]} : vector<16x256xf32> to vector<16x128xf32>
    %16 = arith.negf %15 : vector<16x128xf32>
    %17 = math.exp %16 : vector<16x128xf32>
    %cst_12 = arith.constant 1.000000e+00 : f32
    %18 = vector.broadcast %cst_12 : f32 to vector<16x128xf32>
    %19 = arith.addf %18, %17 : vector<16x128xf32>
    %20 = arith.divf %18, %19 : vector<16x128xf32>
    %21 = vector.extract_strided_slice %20 {offsets = [0, 0], sizes = [16, 64], strides = [1, 1]} : vector<16x128xf32> to vector<16x64xf32>
    %22 = vector.extract_strided_slice %20 {offsets = [0, 64], sizes = [16, 64], strides = [1, 1]} : vector<16x128xf32> to vector<16x64xf32>
    %23 = vector.extract_strided_slice %14 {offsets = [0, 128], sizes = [16, 64], strides = [1, 1]} : vector<16x256xf32> to vector<16x64xf32>
    %24 = vector.extract_strided_slice %14 {offsets = [0, 192], sizes = [16, 64], strides = [1, 1]} : vector<16x256xf32> to vector<16x64xf32>
    %25 = arith.mulf %21, %24 : vector<16x64xf32>
    %26 = arith.addf %23, %25 : vector<16x64xf32>
    %27 = math.tanh %26 : vector<16x64xf32>
    %cst_13 = arith.constant 1.000000e+00 : f32
    %28 = vector.broadcast %cst_13 : f32 to vector<16x64xf32>
    %29 = arith.subf %28, %22 : vector<16x64xf32>
    %30 = arith.mulf %29, %27 : vector<16x64xf32>
    %31 = arith.mulf %22, %8 : vector<16x64xf32>
    %32 = arith.addf %30, %31 : vector<16x64xf32>
    %33 = arith.index_cast %10 : i32 to index
    %c0_14 = arith.constant 0 : index
    %34 = vector.load %arg8[%33, %c0_14] : memref<64x64xf32, #tpu.memory_space<vmem>>, vector<16x64xf32>
    tpu.vector_store %arg8[%33, %c0_14], %32 {strides = array<i32>} : memref<64x64xf32, #tpu.memory_space<vmem>>, vector<16x64xf32>,
    %c1_i32 = arith.constant 1 : i32
    %c16_i32_15 = arith.constant 16 : i32
    %35 = arith.muli %c1_i32, %c16_i32_15 : i32
    %36 = tpu.assume_multiple %35, 16 : i32
    %37 = arith.index_cast %36 : i32 to index
    %c0_16 = arith.constant 0 : index
    %38 = vector.load %arg7[%37, %c0_16] : memref<64x256xf32, #tpu.memory_space<vmem>>, vector<16x256xf32>
    %cst_17 = arith.constant dense<0.000000e+00> : vector<16x256xf32>
    %39 = tpu.matmul %32, %7, %cst_17 {dimension_numbers = #tpu.dot_dimension_numbers<[1], [0], [0], [1], [0, 0, 1, 1], [], []>} : vector<16x64xf32>, vector<64x256xf32>, vector<16x256xf32> -> vector<16x256xf32>
    %40 = arith.addf %38, %39 : vector<16x256xf32>
    %41 = vector.extract_strided_slice %40 {offsets = [0, 0], sizes = [16, 128], strides = [1, 1]} : vector<16x256xf32> to vector<16x128xf32>
    %42 = arith.negf %41 : vector<16x128xf32>
    %43 = math.exp %42 : vector<16x128xf32>
    %cst_18 = arith.constant 1.000000e+00 : f32
    %44 = vector.broadcast %cst_18 : f32 to vector<16x128xf32>
    %45 = arith.addf %44, %43 : vector<16x128xf32>
    %46 = arith.divf %44, %45 : vector<16x128xf32>
    %47 = vector.extract_strided_slice %46 {offsets = [0, 0], sizes = [16, 64], strides = [1, 1]} : vector<16x128xf32> to vector<16x64xf32>
    %48 = vector.extract_strided_slice %46 {offsets = [0, 64], sizes = [16, 64], strides = [1, 1]} : vector<16x128xf32> to vector<16x64xf32>
    %49 = vector.extract_strided_slice %40 {offsets = [0, 128], sizes = [16, 64], strides = [1, 1]} : vector<16x256xf32> to vector<16x64xf32>
    %50 = vector.extract_strided_slice %40 {offsets = [0, 192], sizes = [16, 64], strides = [1, 1]} : vector<16x256xf32> to vector<16x64xf32>
    %51 = arith.mulf %47, %50 : vector<16x64xf32>
    %52 = arith.addf %49, %51 : vector<16x64xf32>
    %53 = math.tanh %52 : vector<16x64xf32>
    %cst_19 = arith.constant 1.000000e+00 : f32
    %54 = vector.broadcast %cst_19 : f32 to vector<16x64xf32>
    %55 = arith.subf %54, %48 : vector<16x64xf32>
    %56 = arith.mulf %55, %53 : vector<16x64xf32>
    %57 = arith.mulf %48, %32 : vector<16x64xf32>
    %58 = arith.addf %56, %57 : vector<16x64xf32>
    %59 = arith.index_cast %36 : i32 to index
    %c0_20 = arith.constant 0 : index
    %60 = vector.load %arg8[%59, %c0_20] : memref<64x64xf32, #tpu.memory_space<vmem>>, vector<16x64xf32>
    tpu.vector_store %arg8[%59, %c0_20], %58 {strides = array<i32>} : memref<64x64xf32, #tpu.memory_space<vmem>>, vector<16x64xf32>,
    %c2_i32 = arith.constant 2 : i32
    %c16_i32_21 = arith.constant 16 : i32
    %61 = arith.muli %c2_i32, %c16_i32_21 : i32
    %62 = tpu.assume_multiple %61, 16 : i32
    %63 = arith.index_cast %62 : i32 to index
    %c0_22 = arith.constant 0 : index
    %64 = vector.load %arg7[%63, %c0_22] : memref<64x256xf32, #tpu.memory_space<vmem>>, vector<16x256xf32>
    %cst_23 = arith.constant dense<0.000000e+00> : vector<16x256xf32>
    %65 = tpu.matmul %58, %7, %cst_23 {dimension_numbers = #tpu.dot_dimension_numbers<[1], [0], [0], [1], [0, 0, 1, 1], [], []>} : vector<16x64xf32>, vector<64x256xf32>, vector<16x256xf32> -> vector<16x256xf32>
    %66 = arith.addf %64, %65 : vector<16x256xf32>
    %67 = vector.extract_strided_slice %66 {offsets = [0, 0], sizes = [16, 128], strides = [1, 1]} : vector<16x256xf32> to vector<16x128xf32>
    %68 = arith.negf %67 : vector<16x128xf32>
    %69 = math.exp %68 : vector<16x128xf32>
    %cst_24 = arith.constant 1.000000e+00 : f32
    %70 = vector.broadcast %cst_24 : f32 to vector<16x128xf32>
    %71 = arith.addf %70, %69 : vector<16x128xf32>
    %72 = arith.divf %70, %71 : vector<16x128xf32>
    %73 = vector.extract_strided_slice %72 {offsets = [0, 0], sizes = [16, 64], strides = [1, 1]} : vector<16x128xf32> to vector<16x64xf32>
    %74 = vector.extract_strided_slice %72 {offsets = [0, 64], sizes = [16, 64], strides = [1, 1]} : vector<16x128xf32> to vector<16x64xf32>
    %75 = vector.extract_strided_slice %66 {offsets = [0, 128], sizes = [16, 64], strides = [1, 1]} : vector<16x256xf32> to vector<16x64xf32>
    %76 = vector.extract_strided_slice %66 {offsets = [0, 192], sizes = [16, 64], strides = [1, 1]} : vector<16x256xf32> to vector<16x64xf32>
    %77 = arith.mulf %73, %76 : vector<16x64xf32>
    %78 = arith.addf %75, %77 : vector<16x64xf32>
    %79 = math.tanh %78 : vector<16x64xf32>
    %cst_25 = arith.constant 1.000000e+00 : f32
    %80 = vector.broadcast %cst_25 : f32 to vector<16x64xf32>
    %81 = arith.subf %80, %74 : vector<16x64xf32>
    %82 = arith.mulf %81, %79 : vector<16x64xf32>
    %83 = arith.mulf %74, %58 : vector<16x64xf32>
    %84 = arith.addf %82, %83 : vector<16x64xf32>
    %85 = arith.index_cast %62 : i32 to index
    %c0_26 = arith.constant 0 : index
    %86 = vector.load %arg8[%85, %c0_26] : memref<64x64xf32, #tpu.memory_space<vmem>>, vector<16x64xf32>
    tpu.vector_store %arg8[%85, %c0_26], %84 {strides = array<i32>} : memref<64x64xf32, #tpu.memory_space<vmem>>, vector<16x64xf32>,
    %c3_i32 = arith.constant 3 : i32
    %c16_i32_27 = arith.constant 16 : i32
    %87 = arith.muli %c3_i32, %c16_i32_27 : i32
    %88 = tpu.assume_multiple %87, 16 : i32
    %89 = arith.index_cast %88 : i32 to index
    %c0_28 = arith.constant 0 : index
    %90 = vector.load %arg7[%89, %c0_28] : memref<64x256xf32, #tpu.memory_space<vmem>>, vector<16x256xf32>
    %cst_29 = arith.constant dense<0.000000e+00> : vector<16x256xf32>
    %91 = tpu.matmul %84, %7, %cst_29 {dimension_numbers = #tpu.dot_dimension_numbers<[1], [0], [0], [1], [0, 0, 1, 1], [], []>} : vector<16x64xf32>, vector<64x256xf32>, vector<16x256xf32> -> vector<16x256xf32>
    %92 = arith.addf %90, %91 : vector<16x256xf32>
    %93 = vector.extract_strided_slice %92 {offsets = [0, 0], sizes = [16, 128], strides = [1, 1]} : vector<16x256xf32> to vector<16x128xf32>
    %94 = arith.negf %93 : vector<16x128xf32>
    %95 = math.exp %94 : vector<16x128xf32>
    %cst_30 = arith.constant 1.000000e+00 : f32
    %96 = vector.broadcast %cst_30 : f32 to vector<16x128xf32>
    %97 = arith.addf %96, %95 : vector<16x128xf32>
    %98 = arith.divf %96, %97 : vector<16x128xf32>
    %99 = vector.extract_strided_slice %98 {offsets = [0, 0], sizes = [16, 64], strides = [1, 1]} : vector<16x128xf32> to vector<16x64xf32>
    %100 = vector.extract_strided_slice %98 {offsets = [0, 64], sizes = [16, 64], strides = [1, 1]} : vector<16x128xf32> to vector<16x64xf32>
    %101 = vector.extract_strided_slice %92 {offsets = [0, 128], sizes = [16, 64], strides = [1, 1]} : vector<16x256xf32> to vector<16x64xf32>
    %102 = vector.extract_strided_slice %92 {offsets = [0, 192], sizes = [16, 64], strides = [1, 1]} : vector<16x256xf32> to vector<16x64xf32>
    %103 = arith.mulf %99, %102 : vector<16x64xf32>
    %104 = arith.addf %101, %103 : vector<16x64xf32>
    %105 = math.tanh %104 : vector<16x64xf32>
    %cst_31 = arith.constant 1.000000e+00 : f32
    %106 = vector.broadcast %cst_31 : f32 to vector<16x64xf32>
    %107 = arith.subf %106, %100 : vector<16x64xf32>
    %108 = arith.mulf %107, %105 : vector<16x64xf32>
    %109 = arith.mulf %100, %84 : vector<16x64xf32>
    %110 = arith.addf %108, %109 : vector<16x64xf32>
    %111 = arith.index_cast %88 : i32 to index
    %c0_32 = arith.constant 0 : index
    %112 = vector.load %arg8[%111, %c0_32] : memref<64x64xf32, #tpu.memory_space<vmem>>, vector<16x64xf32>
    tpu.vector_store %arg8[%111, %c0_32], %110 {strides = array<i32>} : memref<64x64xf32, #tpu.memory_space<vmem>>, vector<16x64xf32>,
    %c4_i32 = arith.constant 4 : i32
    %cst_33 = arith.constant 0.000000e+00 : f32
    %113 = vector.broadcast %cst_33 : f32 to vector<4x128xf32>
    %c0_34 = arith.constant 0 : index
    %c0_35 = arith.constant 0 : index
    %114 = tpu.strided_load %arg8[%c0_34, %c0_35] {strides = array<i32: 16, 1>} : memref<64x64xf32, #tpu.memory_space<vmem>>, vector<4x64xf32>
    %c0_36 = arith.constant 0 : index
    %c0_37 = arith.constant 0 : index
    %115 = vector.load %arg4[%c0_36, %c0_37] : memref<576x128xf32, #tpu.memory_space<vmem>>, vector<64x128xf32>
    %cst_38 = arith.constant dense<0.000000e+00> : vector<4x128xf32>
    %116 = tpu.matmul %114, %115, %cst_38 {dimension_numbers = #tpu.dot_dimension_numbers<[1], [0], [0], [1], [0, 0, 1, 1], [], []>} : vector<4x64xf32>, vector<64x128xf32>, vector<4x128xf32> -> vector<4x128xf32>
    %117 = arith.addf %113, %116 : vector<4x128xf32>
    %c1 = arith.constant 1 : index
    %c0_39 = arith.constant 0 : index
    %118 = tpu.strided_load %arg8[%c1, %c0_39] {strides = array<i32: 16, 1>} : memref<64x64xf32, #tpu.memory_space<vmem>>, vector<4x64xf32>
    %c64 = arith.constant 64 : index
    %c0_40 = arith.constant 0 : index
    %119 = vector.load %arg4[%c64, %c0_40] : memref<576x128xf32, #tpu.memory_space<vmem>>, vector<64x128xf32>
    %cst_41 = arith.constant dense<0.000000e+00> : vector<4x128xf32>
    %120 = tpu.matmul %118, %119, %cst_41 {dimension_numbers = #tpu.dot_dimension_numbers<[1], [0], [0], [1], [0, 0, 1, 1], [], []>} : vector<4x64xf32>, vector<64x128xf32>, vector<4x128xf32> -> vector<4x128xf32>
    %121 = arith.addf %117, %120 : vector<4x128xf32>
    %c2 = arith.constant 2 : index
    %c0_42 = arith.constant 0 : index
    %122 = tpu.strided_load %arg8[%c2, %c0_42] {strides = array<i32: 16, 1>} : memref<64x64xf32, #tpu.memory_space<vmem>>, vector<4x64xf32>
    %c128 = arith.constant 128 : index
    %c0_43 = arith.constant 0 : index
    %123 = vector.load %arg4[%c128, %c0_43] : memref<576x128xf32, #tpu.memory_space<vmem>>, vector<64x128xf32>
    %cst_44 = arith.constant dense<0.000000e+00> : vector<4x128xf32>
    %124 = tpu.matmul %122, %123, %cst_44 {dimension_numbers = #tpu.dot_dimension_numbers<[1], [0], [0], [1], [0, 0, 1, 1], [], []>} : vector<4x64xf32>, vector<64x128xf32>, vector<4x128xf32> -> vector<4x128xf32>
    %125 = arith.addf %121, %124 : vector<4x128xf32>
    %c3 = arith.constant 3 : index
    %c0_45 = arith.constant 0 : index
    %126 = tpu.strided_load %arg8[%c3, %c0_45] {strides = array<i32: 16, 1>} : memref<64x64xf32, #tpu.memory_space<vmem>>, vector<4x64xf32>
    %c192 = arith.constant 192 : index
    %c0_46 = arith.constant 0 : index
    %127 = vector.load %arg4[%c192, %c0_46] : memref<576x128xf32, #tpu.memory_space<vmem>>, vector<64x128xf32>
    %cst_47 = arith.constant dense<0.000000e+00> : vector<4x128xf32>
    %128 = tpu.matmul %126, %127, %cst_47 {dimension_numbers = #tpu.dot_dimension_numbers<[1], [0], [0], [1], [0, 0, 1, 1], [], []>} : vector<4x64xf32>, vector<64x128xf32>, vector<4x128xf32> -> vector<4x128xf32>
    %129 = arith.addf %125, %128 : vector<4x128xf32>
    %c4 = arith.constant 4 : index
    %c0_48 = arith.constant 0 : index
    %130 = tpu.strided_load %arg8[%c4, %c0_48] {strides = array<i32: 16, 1>} : memref<64x64xf32, #tpu.memory_space<vmem>>, vector<4x64xf32>
    %c256 = arith.constant 256 : index
    %c0_49 = arith.constant 0 : index
    %131 = vector.load %arg4[%c256, %c0_49] : memref<576x128xf32, #tpu.memory_space<vmem>>, vector<64x128xf32>
    %cst_50 = arith.constant dense<0.000000e+00> : vector<4x128xf32>
    %132 = tpu.matmul %130, %131, %cst_50 {dimension_numbers = #tpu.dot_dimension_numbers<[1], [0], [0], [1], [0, 0, 1, 1], [], []>} : vector<4x64xf32>, vector<64x128xf32>, vector<4x128xf32> -> vector<4x128xf32>
    %133 = arith.addf %129, %132 : vector<4x128xf32>
    %c5 = arith.constant 5 : index
    %c0_51 = arith.constant 0 : index
    %134 = tpu.strided_load %arg8[%c5, %c0_51] {strides = array<i32: 16, 1>} : memref<64x64xf32, #tpu.memory_space<vmem>>, vector<4x64xf32>
    %c320 = arith.constant 320 : index
    %c0_52 = arith.constant 0 : index
    %135 = vector.load %arg4[%c320, %c0_52] : memref<576x128xf32, #tpu.memory_space<vmem>>, vector<64x128xf32>
    %cst_53 = arith.constant dense<0.000000e+00> : vector<4x128xf32>
    %136 = tpu.matmul %134, %135, %cst_53 {dimension_numbers = #tpu.dot_dimension_numbers<[1], [0], [0], [1], [0, 0, 1, 1], [], []>} : vector<4x64xf32>, vector<64x128xf32>, vector<4x128xf32> -> vector<4x128xf32>
    %137 = arith.addf %133, %136 : vector<4x128xf32>
    %c6 = arith.constant 6 : index
    %c0_54 = arith.constant 0 : index
    %138 = tpu.strided_load %arg8[%c6, %c0_54] {strides = array<i32: 16, 1>} : memref<64x64xf32, #tpu.memory_space<vmem>>, vector<4x64xf32>
    %c384 = arith.constant 384 : index
    %c0_55 = arith.constant 0 : index
    %139 = vector.load %arg4[%c384, %c0_55] : memref<576x128xf32, #tpu.memory_space<vmem>>, vector<64x128xf32>
    %cst_56 = arith.constant dense<0.000000e+00> : vector<4x128xf32>
    %140 = tpu.matmul %138, %139, %cst_56 {dimension_numbers = #tpu.dot_dimension_numbers<[1], [0], [0], [1], [0, 0, 1, 1], [], []>} : vector<4x64xf32>, vector<64x128xf32>, vector<4x128xf32> -> vector<4x128xf32>
    %141 = arith.addf %137, %140 : vector<4x128xf32>
    %c7 = arith.constant 7 : index
    %c0_57 = arith.constant 0 : index
    %142 = tpu.strided_load %arg8[%c7, %c0_57] {strides = array<i32: 16, 1>} : memref<64x64xf32, #tpu.memory_space<vmem>>, vector<4x64xf32>
    %c448 = arith.constant 448 : index
    %c0_58 = arith.constant 0 : index
    %143 = vector.load %arg4[%c448, %c0_58] : memref<576x128xf32, #tpu.memory_space<vmem>>, vector<64x128xf32>
    %cst_59 = arith.constant dense<0.000000e+00> : vector<4x128xf32>
    %144 = tpu.matmul %142, %143, %cst_59 {dimension_numbers = #tpu.dot_dimension_numbers<[1], [0], [0], [1], [0, 0, 1, 1], [], []>} : vector<4x64xf32>, vector<64x128xf32>, vector<4x128xf32> -> vector<4x128xf32>
    %145 = arith.addf %141, %144 : vector<4x128xf32>
    %c8 = arith.constant 8 : index
    %c0_60 = arith.constant 0 : index
    %146 = tpu.strided_load %arg8[%c8, %c0_60] {strides = array<i32: 16, 1>} : memref<64x64xf32, #tpu.memory_space<vmem>>, vector<4x64xf32>
    %c512 = arith.constant 512 : index
    %c0_61 = arith.constant 0 : index
    %147 = vector.load %arg4[%c512, %c0_61] : memref<576x128xf32, #tpu.memory_space<vmem>>, vector<64x128xf32>
    %cst_62 = arith.constant dense<0.000000e+00> : vector<4x128xf32>
    %148 = tpu.matmul %146, %147, %cst_62 {dimension_numbers = #tpu.dot_dimension_numbers<[1], [0], [0], [1], [0, 0, 1, 1], [], []>} : vector<4x64xf32>, vector<64x128xf32>, vector<4x128xf32> -> vector<4x128xf32>
    %149 = arith.addf %145, %148 : vector<4x128xf32>
    %c0_63 = arith.constant 0 : index
    %c0_64 = arith.constant 0 : index
    %150 = vector.load %arg5[%c0_63, %c0_64] : memref<1x128xf32, #tpu.memory_space<vmem>>, vector<1x128xf32>
    %151 = vector.broadcast %150 : vector<1x128xf32> to vector<4x128xf32>
    %152 = arith.addf %149, %151 : vector<4x128xf32>
    %c0_65 = arith.constant 0 : index
    %c0_66 = arith.constant 0 : index
    %153 = vector.load %arg6[%c0_65, %c0_66] : memref<4x128xf32, #tpu.memory_space<vmem>>, vector<4x128xf32>
    tpu.vector_store %arg6[%c0_65, %c0_66], %152 {strides = array<i32>} : memref<4x128xf32, #tpu.memory_space<vmem>>, vector<4x128xf32>,
    return
  }
}

</mosaic_0001>

<bundles_post_ra>
// kernel: tpu_custom_call.1
= control target key start
LH: loop header
LB: loop body
LE: loop exit
PB: predicated region body
PF: predicated region fallthrough
CT: control target
= control target key end

     0   :  { %11 = vsyncpa [#allocation5], 0  ;;  %s2604_s0 = inlined_call_operand.vmem [shape: f32[64,32], index: 0, kind: input, shape index: {}]   ;;  %s2605_s1 = inlined_call_operand.vmem [shape: f32[32,256], index: 1, kind: input, shape index: {}]   ;;  %s2606_s2 = inlined_call_operand.hbm [shape: f32[64,256], index: 2, kind: input, shape index: {}]   ;;  %s2607_s3 = inlined_call_operand.vmem [shape: f32[1,256], index: 3, kind: input, shape index: {}]   ;;  %s2608_s4 = inlined_call_operand.hbm [shape: f32[576,128], index: 4, kind: input, shape index: {}]   ;;  %s2609_s5 = inlined_call_operand.vmem [shape: f32[1,128], index: 5, kind: input, shape index: {}]   ;;  %s2610_s6 = inlined_call_operand.hbm [shape: f32[4,128], index: 6, kind: output, shape index: {}]  }
   0x1   :  { %12 = vsyncpa [#allocation8], 0 }
   0x2   :  { %13 = vsyncpa [#allocation6], 0  ;;  %s2255_s21 = smov [#allocation4]   ;;  %s2183_s25 = scalar_lea.hbm %s2606_s2, 2048 }
   0x3   :  { %s23_s22 = sshll.u32 %s2255_s21, 4  ;;  %p2184_p0 = scmp.ne.s32.totalorder %s2606_s2, %s2183_s25  ;;  %s24_s22 = int_to_ptr.vmem [resolvable:$true] %s23_s22 }
   0x4   :  { %p2187_p1 = scmp.lt.u32.totalorder %s2183_s25, %s2606_s2 }
   0x6   :  { %p2189_p2 = pnand %p2187_p1, %p2184_p0 }
   0x8   :  { %2192 = shalt.err (!%p2189_p2)
}
   0x9   :  { %s2193_s30 = scalar_lea.vmem %s24_s22, 2048  ;;  %p2198_p4 = scmp.lt.s32.totalorder %s24_s22, %s24_s22 }
   0xa   :  { %p2194_p3 = scmp.ne.s32.totalorder %s24_s22, %s2193_s30  ;;  %p2199_p5 = scmp.lt.s32.totalorder %s2193_s30, %s2193_s30 }
   0xc   :  { %p2200_p6 = por %p2199_p5, %p2198_p4 }
   0xe   :  { %p2201_p7 = pnand %p2200_p6, %p2194_p3 }
  0x10   :  { %2204 = shalt.err (!%p2201_p7)
}
  0x11   :  { %s2256_s7 = smov 256   ;;  %s2257_s8 = smov 16  }
  0x12   :  { %29 = dma.hbm_to_vmem [thread:$0]  %s2606_s2, 2048, %s24_s22, [#allocation5], %s2256_s7, %s2256_s7, %s2257_s8  }
  0x13   :  { %s2258_s11 = smov [#allocation7]   ;;  %s2205_s15 = scalar_lea.hbm %s2608_s4, 9216 }
  0x14   :  { %s37_s12 = sshll.u32 %s2258_s11, 4  ;;  %p2206_p8 = scmp.ne.s32.totalorder %s2608_s4, %s2205_s15  ;;  %s38_s12 = int_to_ptr.vmem [resolvable:$true] %s37_s12 }
  0x15   :  { %p2209_p9 = scmp.lt.u32.totalorder %s2205_s15, %s2608_s4 }
  0x17   :  { %p2211_p10 = pnand %p2209_p9, %p2206_p8 }
  0x19   :  { %2214 = shalt.err (!%p2211_p10)
}
  0x1a   :  { %s2215_s20 = scalar_lea.vmem %s38_s12, 9216  ;;  %p2220_p12 = scmp.lt.s32.totalorder %s38_s12, %s38_s12 }
  0x1b   :  { %p2216_p11 = scmp.ne.s32.totalorder %s38_s12, %s2215_s20  ;;  %p2221_p13 = scmp.lt.s32.totalorder %s2215_s20, %s2215_s20 }
  0x1d   :  { %p2222_p0 = por %p2221_p13, %p2220_p12 }
  0x1f   :  { %p2223_p1 = pnand %p2222_p0, %p2216_p11 }
  0x21   :  { %2226 = shalt.err (!%p2223_p1)
}
  0x22   :  { %s2259_s2 = smov 128   ;;  %s2260_s21 = smov 8  }
  0x23   :  { %43 = dma.hbm_to_vmem [thread:$0]  %s2608_s4, 9216, %s38_s12, [#allocation8], %s2259_s2, %s2259_s2, %s2260_s21  }
  0x24   :  { %2249 = dma.done.wait [#allocation5], 2048  }
  0x25   :  { %2250 = vsyncadd [#allocation5], 4294965248 }
  0x26   :  { %2251 = dma.done.wait [#allocation8], 9216  }
  0x27   :  { %2252 = vsyncadd [#allocation8], 4294958080  ;;  %v2261_v0 = vmov 0.0   ;;  %v61_v1 = vld [vmem:[%s2605_s1 + $0x8] sm:$0xff]  ;;  %v63_v2 = vld [vmem:[%s2605_s1 + $0x18] sm:$0xff]  ;;  %vm80_vm0 = vcmask 261120   ;;  %v70_v45 = vlaneseq }
  0x28   :  { %169 = vmatprep.mubr.f32.mxu0 %v2261_v0  ;;  %v60_v3 = vld [vmem:[%s2605_s1] sm:$0xff]  ;;  %v1912_v4 = vpack.c.bf16 %v63_v2, %v61_v1  ;;  %v62_v5 = vld [vmem:[%s2605_s1 + $0x10] sm:$0xff]  ;;  %v65_v6 = vld [vmem:[%s2605_s1 + $0x28] sm:$0xff]  ;;  %s2262_s4 = smov 64   ;;  %vm257_vm1 = vcmask 523264   ;;  %vm2264_vm2 = vmmov 0  }
  0x29   :  { %v67_v7 = vld [vmem:[%s2605_s1 + $0x38] sm:$0xff]  ;;  %v1914_v8 = vpack.c.bf16 %v62_v5, %v60_v3  ;;  %v64_v10 = vld [vmem:[%s2605_s1 + $0x20] sm:$0xff]  ;;  %v66_v11 = vld [vmem:[%s2605_s1 + $0x30] sm:$0xff]  ;;  %v71_v46 = vshrl.u32 %v70_v45, 7  ;;  %1757 = vmatprep.mubr.msk.f32.mxu1 %vm2264_vm2, %v2261_v0  ;;  %s2265_s7 = smov [#allocation9]  }
  0x2a   :  { %v1916_v9 = vpack.c.bf16 %v67_v7, %v65_v6  ;;  %1913 = vmatprep.subr.bf16.mxu0 %v1912_v4  ;;  %v235_v12 = vld [vmem:[#allocation4 + $0x8] sm:$0xff]  ;;  %v237_v13 = vld [vmem:[#allocation4 + $0x18] sm:$0xff]  ;;  %v1918_v14 = vpack.c.bf16 %v66_v11, %v64_v10  ;;  %v234_v16 = vld [vmem:[#allocation4] sm:$0xff]  ;;  %s1615_s8 = sshll.u32 %s2265_s7, 4  ;;  %s1616_s8 = int_to_ptr.vmem [resolvable:$true] %s1615_s8 }
  0x2b   :  { %1915 = vmatpush1.bf16.msra.mxu0 %v1914_v8  ;;  %v2350_v15 = vpack.c.bf16 %v237_v13, %v235_v12  ;;  %v236_v17 = vld [vmem:[#allocation4 + $0x10] sm:$0xff]  ;;  %v239_v18 = vld [vmem:[#allocation4 + $0x28] sm:$0xff]  ;;  %v241_v19 = vld [vmem:[#allocation4 + $0x38] sm:$0xff]  ;;  %v76_v47 = vsub.s32 1, %v71_v46  ;;  %v72_v56 = vsub.s32 0, %v71_v46  ;;  %s2227_s9 = scalar_lea.vmem %s1616_s8, 64  ;;  %p2232_p3 = scmp.lt.s32.totalorder %s1616_s8, %s1616_s8 }
  0x2c   :  { %1917 = vmatprep.subr.bf16.mxu0 %v1916_v9  ;;  %v52_v20 = vld [vmem:[%s2604_s0] sm:$0xff]  ;;  %v2355_v21 = vpack.c.bf16 %v236_v17, %v234_v16  ;;  %v2358_v22 = vpack.c.bf16 %v241_v19, %v239_v18  ;;  %v240_v24 = vld [vmem:[#allocation4 + $0x30] sm:$0xff]  ;;  %v243_v25 = vld [vmem:[#allocation4 + $0x48] sm:$0xff]  ;;  %p2228_p2 = scmp.ne.s32.totalorder %s1616_s8, %s2227_s9  ;;  %p2233_p4 = scmp.lt.s32.totalorder %s2227_s9, %s2227_s9 }
  0x2d   :  { %v238_v23 = vld [vmem:[#allocation4 + $0x20] sm:$0xff]  ;;  %v245_v26 = vld [vmem:[#allocation4 + $0x58] sm:$0xff]  ;;  %v53_v27 = vld [vmem:[%s2604_s0 + $0x8] sm:$0xff] }
  0x2e   :  { %v2366_v28 = vpack.c.bf16 %v240_v24, %v238_v23  ;;  %v2369_v29 = vpack.c.bf16 %v245_v26, %v243_v25  ;;  %v242_v30 = vld [vmem:[#allocation4 + $0x40] sm:$0xff]  ;;  %v244_v31 = vld [vmem:[#allocation4 + $0x50] sm:$0xff]  ;;  %v247_v32 = vld [vmem:[#allocation4 + $0x68] sm:$0xff]  ;;  %p2234_p5 = por %p2233_p4, %p2232_p3 }
  0x2f   :  { %1919 = vmatpush1.bf16.msra.mxu0 %v1918_v14  ;;  %v249_v33 = vld [vmem:[#allocation4 + $0x78] sm:$0xff]  ;;  %v54_v34 = vld [vmem:[%s2604_s0 + $0x10] sm:$0xff]  ;;  %v2377_v35 = vpack.c.bf16 %v244_v31, %v242_v30  ;;  %v246_v37 = vld [vmem:[#allocation4 + $0x60] sm:$0xff] }
  0x30   :  { %1921 = vmatprep.subr.bf16.mxu0 %v2350_v15  ;;  %v2380_v36 = vpack.c.bf16 %v249_v33, %v247_v32  ;;  %v248_v38 = vld [vmem:[#allocation4 + $0x70] sm:$0xff]  ;;  %v55_v39 = vld [vmem:[%s2604_s0 + $0x18] sm:$0xff]  ;;  %v56_v41 = vld [vmem:[%s2604_s0 + $0x20] sm:$0xff]  ;;  %p2235_p6 = pnand %p2234_p5, %p2228_p2 }
  0x31   :  { %v2388_v40 = vpack.c.bf16 %v248_v38, %v246_v37  ;;  %v57_v42 = vld [vmem:[%s2604_s0 + $0x28] sm:$0xff]  ;;  %v58_v43 = vld [vmem:[%s2604_s0 + $0x30] sm:$0xff]  ;;  %v59_v44 = vld [vmem:[%s2604_s0 + $0x38] sm:$0xff] }
  0x32   :  { %1628 = vmatmul.mubr.msk.f32.vlgmr.msra.gmra.mrb[0].mxu0 %vm80_vm0, %v52_v20  ;;  %v68_v48 = vld [vmem:[%s2607_s3] sm:$0x3] }
  0x33   :  { %1923 = vmatpush1.bf16.msra.mxu0 %v2355_v21  ;;  %175 = vmatprep.mubr.f32.mxu0 %v2261_v0  ;;  %v2430_v49 = vrot.slane %v68_v48, %v76_v47  ;;  %v2436_v57 = vrot.slane %v68_v48, %v72_v56 }
  0x34   :  { %1925 = vmatprep.subr.bf16.mxu0 %v2358_v22 }
  0x36   :  { %1629 = vmatmul.mubr.msk.f32.gmra.mrb[2].mxu0 %vm80_vm0, %v53_v27 }
  0x37   :  { %181 = vmatprep.mubr.f32.mxu0 %v2261_v0  ;;  %1927 = vmatpush1.bf16.msra.mxu0 %v2366_v28 }
  0x38   :  { %1929 = vmatprep.subr.bf16.mxu0 %v2369_v29 }
  0x3a   :  { %1630 = vmatmul.mubr.msk.f32.gmra.mrb[4].mxu0 %vm80_vm0, %v54_v34 }
  0x3b   :  { %187 = vmatprep.mubr.f32.mxu0 %v2261_v0  ;;  %1931 = vmatpush1.bf16.msra.mxu0 %v2377_v35 }
  0x3c   :  { %1933 = vmatprep.subr.bf16.mxu0 %v2380_v36 }
  0x3e   :  { %1631 = vmatmul.mubr.msk.f32.gmra.mrb[6].mxu0 %vm80_vm0, %v55_v39 }
  0x3f   :  { %193 = vmatprep.mubr.f32.mxu0 %v2261_v0  ;;  %1935 = vmatpush1.bf16.msra.mxu0 %v2388_v40 }
  0x40   :  { %1937 = vmatprep.subr.bf16.mxu0 %v2350_v15 }
  0x42   :  { %1632 = vmatmul.mubr.msk.f32.gmra.mrb[8].mxu0 %vm80_vm0, %v56_v41 }
  0x43   :  { %199 = vmatprep.mubr.f32.mxu0 %v2261_v0 }
  0x46   :  { %1633 = vmatmul.mubr.msk.f32.gmra.mrb[10].mxu0 %vm80_vm0, %v57_v42 }
  0x47   :  { %205 = vmatprep.mubr.f32.mxu0 %v2261_v0 }
  0x4a   :  { %1634 = vmatmul.mubr.msk.f32.gmra.mrb[12].mxu0 %vm80_vm0, %v58_v43 }
  0x4b   :  { %211 = vmatprep.mubr.f32.mxu0 %v2261_v0 }
  0x4e   :  { %1635 = vmatmul.mubr.msk.f32.gmra.mrb[14].mxu0 %vm80_vm0, %v59_v44 }
  0x4f   :  { %325 = vmatprep.mubr.f32.mxu0 %v2261_v0 }
  0x52   :  { %326 = vmatmul.mubr.f32.vlgmr.msra.gmra.mrb[0].mxu0 %v2261_v0 }
  0x53   :  { %331 = vmatprep.mubr.f32.mxu0 %v2261_v0  ;;  %1939 = vmatpush1.bf16.msra.mxu0 %v2355_v21 }
  0x54   :  { %1941 = vmatprep.subr.bf16.mxu0 %v2358_v22 }
  0x56   :  { %332 = vmatmul.mubr.f32.gmra.mrb[2].mxu0 %v2261_v0 }
  0x57   :  { %1943 = vmatpush1.bf16.msra.mxu0 %v2366_v28  ;;  %469 = vmatprep.mubr.f32.mxu0 %v2261_v0 }
  0x58   :  { %1945 = vmatprep.subr.bf16.mxu0 %v2369_v29 }
  0x5b   :  { %1947 = vmatpush1.bf16.msra.mxu0 %v2377_v35 }
  0x5c   :  { %1949 = vmatprep.subr.bf16.mxu0 %v2380_v36 }
  0x5f   :  { %1951 = vmatpush1.bf16.msra.mxu0 %v2388_v40 }
  0x60   :  { %1953 = vmatprep.subr.bf16.mxu0 %v2350_v15 }
 0x125   :  { %v327_v50 = vpop.f32.mrb[0].mxu0 }
 0x126   :  { %v329_v51 = vpop.f32.mrb[1].mxu0  ;;  %v2092_v58 = vadd.f32 %v327_v50, %v2436_v57 }
 0x127   :  { %v2093_v52 = vadd.f32 %v329_v51, %v2430_v49 }
 0x128   :  { %v1636_v59 = vmul.f32 -1.442695, %v2092_v58 }
 0x129   :  { %356 = vrot.lane.b32.xlu0 %v2093_v52, %s2262_s4  ;;  %v333_v53 = vpop.f32.mrb[2].mxu0 }
 0x12a   :  { %v335_v54 = vpop.f32.mrb[3].mxu0  ;;  %v2094_v60 = vadd.f32 %v333_v53, %v2436_v57  ;;  %2135 = vpow2.f32 %v1636_v59 }
 0x12b   :  { %v2095_v55 = vadd.f32 %v335_v54, %v2430_v49 }
 0x12c   :  { %v1637_v61 = vmul.f32 -1.442695, %v2094_v60 }
 0x12d   :  { %358 = vrot.lane.b32.xlu1 %v2095_v55, %s2262_s4 }
 0x12e   :  { %2137 = vpow2.f32 %v1637_v61 }
 0x134   :  { %v2136_v62 = vpop.eup %2135 }
 0x135   :  { %v348_v63 = vadd.f32 1.0, %v2136_v62 }
 0x137   :  { %2139 = vrcp.f32 %v348_v63 }
 0x138   :  { %v2138_v1 = vpop.eup %2137 }
 0x139   :  { %v349_v2 = vadd.f32 1.0, %v2138_v1 }
 0x13b   :  { %2141 = vrcp.f32 %v349_v2 }
 0x141   :  { %v2140_v3 = vpop.eup %2139 }
 0x142   :  { %v368_v13 = vsub.f32 1.0, %v2140_v3  ;;  %v380_v16 = vmul.f32 0.0, %v2140_v3 }
 0x145   :  { %v2142_v7 = vpop.eup %2141 }
 0x146   :  { %v369_v19 = vsub.f32 1.0, %v2142_v7  ;;  %v381_v23 = vmul.f32 0.0, %v2142_v7 }
 0x19b   :  { %v357_v4 = vpop.permute.xlu0 %356 }
 0x19c   :  { %v362_v5 = vmul.f32 %v2140_v3, %v357_v4 }
 0x19e   :  { %v364_v6 = vadd.f32 %v2093_v52, %v362_v5 }
 0x19f   :  { %v359_v8 = vpop.permute.xlu1 %358 }
 0x1a0   :  { %2143 = vtanh.f32 %v364_v6  ;;  %v363_v9 = vmul.f32 %v2142_v7, %v359_v8 }
 0x1a2   :  { %v365_v10 = vadd.f32 %v2095_v55, %v363_v9 }
 0x1a4   :  { %2145 = vtanh.f32 %v365_v10 }
 0x1aa   :  { %v2144_v11 = vpop.eup %2143 }
 0x1ab   :  { %372 = vrot.lane.b32.xlu0 %v2144_v11, %s2262_s4 }
 0x1ae   :  { %v2146_v12 = vpop.eup %2145 }
 0x1af   :  { %374 = vrot.lane.b32.xlu0 %v2146_v12, %s2262_s4 }
 0x21d   :  { %v373_v14 = vpop.permute.xlu0 %372 }
 0x21e   :  { %v378_v17 = vmul.f32 %v373_v14, %v368_v13 }
 0x220   :  { %v382_v18 = vadd.f32 %v380_v16, %v378_v17 }
 0x221   :  { %v375_v20 = vpop.permute.xlu0 %374 }
 0x222   :  { %v379_v24 = vmul.f32 %v375_v20, %v369_v19  ;;  %386 = vrot.lane.b32.xlu1 %v382_v18, %s2262_s4 }
 0x224   :  { %v383_v25 = vadd.f32 %v381_v23, %v379_v24 }
 0x226   :  { %388 = vrot.lane.b32.xlu1 %v383_v25, %s2262_s4 }
 0x294   :  { %v387_v26 = vpop.permute.xlu1 %386 }
 0x295   :  { %392 = vst.msk [vmem:[#allocation3] sm:$0xff] %vm257_vm1, %v387_v26  ;;  %1638 = vmatmul.mubr.msk.f32.vlgmr.msra.gmra.mrb[4].mxu0 %vm257_vm1, %v387_v26 }
 0x296   :  { %475 = vmatprep.mubr.f32.mxu0 %v2261_v0  ;;  %1955 = vmatpush1.bf16.msra.mxu0 %v2355_v21 }
 0x297   :  { %1957 = vmatprep.subr.bf16.mxu0 %v2358_v22 }
 0x298   :  { %v389_v27 = vpop.permute.xlu1 %388 }
 0x299   :  { %393 = vst.msk [vmem:[#allocation3 + $0x8] sm:$0xff] %vm257_vm1, %v389_v27  ;;  %1639 = vmatmul.mubr.msk.f32.gmra.mrb[6].mxu0 %vm257_vm1, %v389_v27 }
 0x29a   :  { %1959 = vmatpush1.bf16.msra.mxu0 %v2366_v28  ;;  %614 = vmatprep.mubr.f32.mxu0 %v2261_v0 }
 0x29b   :  { %1961 = vmatprep.subr.bf16.mxu0 %v2369_v29 }
 0x29e   :  { %1963 = vmatpush1.bf16.msra.mxu0 %v2377_v35 }
 0x29f   :  { %1965 = vmatprep.subr.bf16.mxu0 %v2380_v36 }
 0x2a2   :  { %1967 = vmatpush1.bf16.msra.mxu0 %v2388_v40 }
 0x2a3   :  { %1969 = vmatprep.subr.bf16.mxu0 %v2350_v15 }
 0x368   :  { %v471_v30 = vpop.f32.mrb[4].mxu0 }
 0x369   :  { %v473_v31 = vpop.f32.mrb[5].mxu0  ;;  %v2096_v38 = vadd.f32 %v471_v30, %v2436_v57 }
 0x36a   :  { %v2097_v32 = vadd.f32 %v473_v31, %v2430_v49 }
 0x36b   :  { %v1640_v39 = vmul.f32 -1.442695, %v2096_v38 }
 0x36c   :  { %500 = vrot.lane.b32.xlu0 %v2097_v32, %s2262_s4  ;;  %v477_v33 = vpop.f32.mrb[6].mxu0 }
 0x36d   :  { %v479_v34 = vpop.f32.mrb[7].mxu0  ;;  %v2098_v41 = vadd.f32 %v477_v33, %v2436_v57  ;;  %2147 = vpow2.f32 %v1640_v39 }
 0x36e   :  { %v2099_v37 = vadd.f32 %v479_v34, %v2430_v49 }
 0x36f   :  { %v1641_v42 = vmul.f32 -1.442695, %v2098_v41 }
 0x370   :  { %502 = vrot.lane.b32.xlu0 %v2099_v37, %s2262_s4 }
 0x371   :  { %2149 = vpow2.f32 %v1641_v42 }
 0x377   :  { %v2148_v15 = vpop.eup %2147 }
 0x378   :  { %v492_v43 = vadd.f32 1.0, %v2148_v15 }
 0x37a   :  { %2151 = vrcp.f32 %v492_v43 }
 0x37b   :  { %v2150_v44 = vpop.eup %2149 }
 0x37c   :  { %v493_v45 = vadd.f32 1.0, %v2150_v44 }
 0x37e   :  { %2153 = vrcp.f32 %v493_v45 }
 0x384   :  { %v2152_v46 = vpop.eup %2151 }
 0x385   :  { %v512_v58 = vsub.f32 1.0, %v2152_v46  ;;  %v524_v60 = vmul.f32 %v2152_v46, %v382_v18 }
 0x388   :  { %v2154_v51 = vpop.eup %2153 }
 0x389   :  { %v513_v63 = vsub.f32 1.0, %v2154_v51  ;;  %v525_v2 = vmul.f32 %v2154_v51, %v383_v25 }
 0x3de   :  { %v501_v47 = vpop.permute.xlu0 %500 }
 0x3df   :  { %v506_v48 = vmul.f32 %v2152_v46, %v501_v47 }
 0x3e1   :  { %v508_v50 = vadd.f32 %v2097_v32, %v506_v48 }
 0x3e2   :  { %v503_v52 = vpop.permute.xlu0 %502 }
 0x3e3   :  { %2155 = vtanh.f32 %v508_v50  ;;  %v507_v53 = vmul.f32 %v2154_v51, %v503_v52 }
 0x3e5   :  { %v509_v54 = vadd.f32 %v2099_v37, %v507_v53 }
 0x3e7   :  { %2157 = vtanh.f32 %v509_v54 }
 0x3ed   :  { %v2156_v55 = vpop.eup %2155 }
 0x3ee   :  { %516 = vrot.lane.b32.xlu1 %v2156_v55, %s2262_s4 }
 0x3f1   :  { %v2158_v56 = vpop.eup %2157 }
 0x3f2   :  { %518 = vrot.lane.b32.xlu0 %v2158_v56, %s2262_s4 }
 0x460   :  { %v517_v59 = vpop.permute.xlu1 %516 }
 0x461   :  { %v522_v61 = vmul.f32 %v517_v59, %v512_v58 }
 0x463   :  { %v526_v62 = vadd.f32 %v524_v60, %v522_v61 }
 0x464   :  { %v519_v1 = vpop.permute.xlu0 %518 }
 0x465   :  { %v523_v3 = vmul.f32 %v519_v1, %v513_v63  ;;  %530 = vrot.lane.b32.xlu1 %v526_v62, %s2262_s4 }
 0x467   :  { %v527_v4 = vadd.f32 %v525_v2, %v523_v3  ;;  %v844_v2 = vld [vmem:[#allocation7 + $0x40] sm:$0xff]  ;;  %v845_v3 = vld [vmem:[#allocation7 + $0x48] sm:$0xff] }
 0x469   :  { %532 = vrot.lane.b32.xlu1 %v527_v4, %s2262_s4 }
 0x4d7   :  { %v531_v5 = vpop.permute.xlu1 %530 }
 0x4d8   :  { %537 = vst.msk [vmem:[#allocation3 + $0x10] sm:$0xff] %vm257_vm1, %v531_v5  ;;  %1642 = vmatmul.mubr.msk.f32.vlgmr.msra.gmra.mrb[8].mxu0 %vm257_vm1, %v531_v5  ;;  %v2263_v5 = vmov 0.0|0.0  }
 0x4d9   :  { %620 = vmatprep.mubr.f32.mxu0 %v2261_v0  ;;  %1971 = vmatpush1.bf16.msra.mxu0 %v2355_v21 }
 0x4da   :  { %1973 = vmatprep.subr.bf16.mxu0 %v2358_v22  ;;  %1984 = vmatprep.subr.bf16.mxu1 %v2263_v5 }
 0x4db   :  { %v533_v6 = vpop.permute.xlu1 %532 }
 0x4dc   :  { %538 = vst.msk [vmem:[#allocation3 + $0x18] sm:$0xff] %vm257_vm1, %v533_v6  ;;  %1643 = vmatmul.mubr.msk.f32.gmra.mrb[10].mxu0 %vm257_vm1, %v533_v6  ;;  %v1985_v6 = vpack.c.bf16 %v845_v3, %v844_v2  ;;  %v838_v2 = vld [vmem:[#allocation7 + $0x30] sm:$0xff]  ;;  %v839_v3 = vld [vmem:[#allocation7 + $0x38] sm:$0xff] }
 0x4dd   :  { %1975 = vmatpush1.bf16.msra.mxu0 %v2366_v28  ;;  %759 = vmatprep.mubr.f32.mxu0 %v2261_v0 }
 0x4de   :  { %1977 = vmatprep.subr.bf16.mxu0 %v2369_v29  ;;  %1986 = vmatpush3.bf16.msra.mxu1 %v1985_v6  ;;  %v1525_v6 = vld [vmem:[#allocation7 + $0x238] sm:$0xff] }
 0x4df   :  { %1987 = vmatprep.subr.bf16.mxu1 %v2263_v5 }
 0x4e1   :  { %1979 = vmatpush1.bf16.msra.mxu0 %v2377_v35 }
 0x4e2   :  { %1981 = vmatprep.subr.bf16.mxu0 %v2380_v36 }
 0x4e5   :  { %1983 = vmatpush1.bf16.msra.mxu0 %v2388_v40 }
 0x4e6   :  { %2056 = vmatprep.subr.bf16.mxu0 %v2263_v5 }
 0x5ab   :  { %v616_v21 = vpop.f32.mrb[8].mxu0 }
 0x5ac   :  { %v618_v7 = vpop.f32.mrb[9].mxu0  ;;  %v2100_v29 = vadd.f32 %v616_v21, %v2436_v57  ;;  %v1347_v21 = vld [vmem:[#allocation7 + $0x188] sm:$0xff] }
 0x5ad   :  { %v2101_v22 = vadd.f32 %v618_v7, %v2430_v49  ;;  %v846_v7 = vld [vmem:[#allocation7 + $0x50] sm:$0xff] }
 0x5ae   :  { %v1644_v10 = vmul.f32 -1.442695, %v2100_v29 }
 0x5af   :  { %645 = vrot.lane.b32.xlu0 %v2101_v22, %s2262_s4  ;;  %v622_v8 = vpop.f32.mrb[10].mxu0 }
 0x5b0   :  { %v624_v9 = vpop.f32.mrb[11].mxu0  ;;  %v2102_v35 = vadd.f32 %v622_v8, %v2436_v57  ;;  %2159 = vpow2.f32 %v1644_v10 }
 0x5b1   :  { %v2103_v28 = vadd.f32 %v624_v9, %v2430_v49  ;;  %v1348_v9 = vld [vmem:[#allocation7 + $0x190] sm:$0xff] }
 0x5b2   :  { %v1645_v36 = vmul.f32 -1.442695, %v2102_v35 }
 0x5b3   :  { %647 = vrot.lane.b32.xlu0 %v2103_v28, %s2262_s4 }
 0x5b4   :  { %2161 = vpow2.f32 %v1645_v36 }
 0x5ba   :  { %v2160_v40 = vpop.eup %2159 }
 0x5bb   :  { %v637_v11 = vadd.f32 1.0, %v2160_v40  ;;  %v848_v40 = vld [vmem:[#allocation7 + $0x60] sm:$0xff] }
 0x5bd   :  { %2163 = vrcp.f32 %v637_v11  ;;  %v849_v11 = vld [vmem:[#allocation7 + $0x68] sm:$0xff] }
 0x5be   :  { %v2162_v12 = vpop.eup %2161 }
 0x5bf   :  { %v638_v13 = vadd.f32 1.0, %v2162_v12  ;;  %v1350_v12 = vld [vmem:[#allocation7 + $0x1a0] sm:$0xff] }
 0x5c1   :  { %2165 = vrcp.f32 %v638_v13  ;;  %v1991_v13 = vpack.c.bf16 %v849_v11, %v848_v40  ;;  %v1004_v11 = vld [vmem:[#allocation7 + $0x90] sm:$0xff] }
 0x5c7   :  { %v2164_v14 = vpop.eup %2163 }
 0x5c8   :  { %v657_v27 = vsub.f32 1.0, %v2164_v14  ;;  %v669_v31 = vmul.f32 %v2164_v14, %v526_v62 }
 0x5cb   :  { %v2166_v19 = vpop.eup %2165 }
 0x5cc   :  { %v658_v34 = vsub.f32 1.0, %v2166_v19  ;;  %v670_v38 = vmul.f32 %v2166_v19, %v527_v4  ;;  %v1346_v4 = vld [vmem:[#allocation7 + $0x180] sm:$0xff] }
 0x5cd   :  { %v2057_v8 = vpack.c.bf16 %v1347_v21, %v1346_v4  ;;  %v1524_v4 = vld [vmem:[#allocation7 + $0x230] sm:$0xff]  ;;  %v2006_v21 = vpack.c.bf16 %v839_v3, %v838_v2  ;;  %v1264_v3 = vld [vmem:[#allocation7 + $0x160] sm:$0xff] }
 0x621   :  { %v646_v16 = vpop.permute.xlu0 %645 }
 0x622   :  { %v651_v17 = vmul.f32 %v2164_v14, %v646_v16  ;;  %v1351_v14 = vld [vmem:[#allocation7 + $0x1a8] sm:$0xff] }
 0x623   :  { %v2063_v16 = vpack.c.bf16 %v1351_v14, %v1350_v12  ;;  %v1005_v12 = vld [vmem:[#allocation7 + $0x98] sm:$0xff]  ;;  %v1006_v14 = vld [vmem:[#allocation7 + $0xa0] sm:$0xff] }
 0x624   :  { %v653_v18 = vadd.f32 %v2101_v22, %v651_v17  ;;  %v847_v22 = vld [vmem:[#allocation7 + $0x58] sm:$0xff]  ;;  %v850_v17 = vld [vmem:[#allocation7 + $0x70] sm:$0xff] }
 0x625   :  { %v648_v20 = vpop.permute.xlu0 %647  ;;  %v1988_v29 = vpack.c.bf16 %v847_v22, %v846_v7  ;;  %v2090_v7 = vpack.c.bf16 %v1525_v6, %v1524_v4  ;;  %v1002_v22 = vld [vmem:[#allocation7 + $0x80] sm:$0xff]  ;;  %v1265_v4 = vld [vmem:[#allocation7 + $0x168] sm:$0xff] }
 0x626   :  { %2167 = vtanh.f32 %v653_v18  ;;  %v652_v23 = vmul.f32 %v2166_v19, %v648_v20  ;;  %v851_v18 = vld [vmem:[#allocation7 + $0x78] sm:$0xff]  ;;  %v1352_v19 = vld [vmem:[#allocation7 + $0x1b0] sm:$0xff]  ;;  %v2051_v6 = vpack.c.bf16 %v1265_v4, %v1264_v3 }
 0x627   :  { %1989 = vmatpush3.bf16.msra.mxu1 %v1988_v29  ;;  %v1994_v20 = vpack.c.bf16 %v851_v18, %v850_v17  ;;  %v829_v29 = vld [vmem:[#allocation3] ss:$16 sm:$0x3] }
 0x628   :  { %v654_v24 = vadd.f32 %v2103_v28, %v652_v23  ;;  %v1349_v28 = vld [vmem:[#allocation7 + $0x198] sm:$0xff]  ;;  %1990 = vmatprep.subr.bf16.mxu1 %v2263_v5  ;;  %v1008_v18 = vld [vmem:[#allocation7 + $0xb0] sm:$0xff] }
 0x629   :  { %v2060_v35 = vpack.c.bf16 %v1349_v28, %v1348_v9  ;;  %v1353_v23 = vld [vmem:[#allocation7 + $0x1b8] sm:$0xff] }
 0x62a   :  { %2169 = vtanh.f32 %v654_v24  ;;  %v2066_v24 = vpack.c.bf16 %v1353_v23, %v1352_v19  ;;  %v1009_v19 = vld [vmem:[#allocation7 + $0xb8] sm:$0xff]  ;;  %v1088_v23 = vld [vmem:[#allocation7 + $0xc0] sm:$0xff] }
 0x62b   :  { %1992 = vmatpush3.bf16.msra.mxu1 %v1991_v13  ;;  %v2012_v13 = vpack.c.bf16 %v1005_v12, %v1004_v11  ;;  %v1436_v12 = vld [vmem:[#allocation7 + $0x1e0] sm:$0xff] }
 0x62c   :  { %1993 = vmatprep.subr.bf16.mxu1 %v2263_v5 }
 0x62f   :  { %1995 = vmatpush3.bf16.msra.mxu1 %v1994_v20  ;;  %v2018_v20 = vpack.c.bf16 %v1009_v19, %v1008_v18 }
 0x630   :  { %v2168_v25 = vpop.eup %2167  ;;  %1996 = vmatprep.subr.bf16.mxu1 %v2263_v5 }
 0x631   :  { %661 = vrot.lane.b32.xlu1 %v2168_v25, %s2262_s4 }
 0x634   :  { %v2170_v26 = vpop.eup %2169 }
 0x635   :  { %663 = vrot.lane.b32.xlu0 %v2170_v26, %s2262_s4 }
 0x6a3   :  { %v662_v30 = vpop.permute.xlu1 %661 }
 0x6a4   :  { %v667_v32 = vmul.f32 %v662_v30, %v657_v27 }
 0x6a6   :  { %v2489_v33 = vadd.f32 %v669_v31, %v667_v32 }
 0x6a7   :  { %v664_v37 = vpop.permute.xlu0 %663 }
 0x6a8   :  { %v668_v39 = vmul.f32 %v664_v37, %v658_v34  ;;  %675 = vrot.lane.b32.xlu1 %v2489_v33, %s2262_s4 }
 0x6aa   :  { %v2493_v41 = vadd.f32 %v670_v38, %v668_v39 }
 0x6ac   :  { %677 = vrot.lane.b32.xlu1 %v2493_v41, %s2262_s4 }
 0x71a   :  { %v676_v42 = vpop.permute.xlu1 %675 }
 0x71b   :  { %682 = vst.msk [vmem:[#allocation3 + $0x20] sm:$0xff] %vm257_vm1, %v676_v42  ;;  %1646 = vmatmul.mubr.msk.f32.vlgmr.msra.gmra.mrb[12].mxu0 %vm257_vm1, %v676_v42 }
 0x71c   :  { %765 = vmatprep.mubr.f32.mxu0 %v2261_v0  ;;  %2058 = vmatpush3.bf16.msra.mxu0 %v2057_v8  ;;  %v1003_v8 = vld [vmem:[#allocation7 + $0x88] sm:$0xff] }
 0x71d   :  { %2059 = vmatprep.subr.bf16.mxu0 %v2263_v5 }
 0x71e   :  { %v678_v15 = vpop.permute.xlu1 %677 }
 0x71f   :  { %683 = vst.msk [vmem:[#allocation3 + $0x28] sm:$0xff] %vm257_vm1, %v678_v15  ;;  %1647 = vmatmul.mubr.msk.f32.gmra.mrb[14].mxu0 %vm257_vm1, %v678_v15 }
 0x720   :  { %2061 = vmatpush3.bf16.msra.mxu0 %v2060_v35  ;;  %1871 = vmatprep.mubr.msk.f32.mxu0 %vm2264_vm2, %v2261_v0  ;;  %v2009_v35 = vpack.c.bf16 %v1003_v8, %v1002_v22  ;;  %v1432_v8 = vld [vmem:[#allocation7 + $0x1c0] sm:$0xff] }
 0x721   :  { %2062 = vmatprep.subr.bf16.mxu0 %v2263_v5 }
 0x724   :  { %2064 = vmatpush3.bf16.msra.mxu0 %v2063_v16  ;;  %v1007_v16 = vld [vmem:[#allocation7 + $0xa8] sm:$0xff] }
 0x725   :  { %2065 = vmatprep.subr.bf16.mxu0 %v2263_v5  ;;  %v2015_v17 = vpack.c.bf16 %v1007_v16, %v1006_v14  ;;  %v1438_v16 = vld [vmem:[#allocation7 + $0x1f0] sm:$0xff] }
 0x728   :  { %2067 = vmatpush3.bf16.msra.mxu0 %v2066_v24  ;;  %v1089_v24 = vld [vmem:[#allocation7 + $0xc8] sm:$0xff] }
 0x729   :  { %2080 = vmatprep.subr.bf16.mxu0 %v2263_v5 }
 0x7ee   :  { %v761_v43 = vpop.f32.mrb[12].mxu0 }
 0x7ef   :  { %v763_v44 = vpop.f32.mrb[13].mxu0  ;;  %v2104_v50 = vadd.f32 %v761_v43, %v2436_v57  ;;  %v832_v43 = vld [vmem:[#allocation7] sm:$0xff] }
 0x7f0   :  { %v2105_v45 = vadd.f32 %v763_v44, %v2430_v49  ;;  %v1518_v44 = vld [vmem:[#allocation7 + $0x200] sm:$0xff] }
 0x7f1   :  { %v1648_v51 = vmul.f32 -1.442695, %v2104_v50 }
 0x7f2   :  { %790 = vrot.lane.b32.xlu0 %v2105_v45, %s2262_s4  ;;  %v767_v46 = vpop.f32.mrb[14].mxu0 }
 0x7f3   :  { %v769_v47 = vpop.f32.mrb[15].mxu0  ;;  %v2106_v52 = vadd.f32 %v767_v46, %v2436_v57  ;;  %2171 = vpow2.f32 %v1648_v51  ;;  %v841_v46 = vld [vmem:[#allocation3 + $0x1] ss:$16 sm:$0x3] }
 0x7f4   :  { %v2107_v48 = vadd.f32 %v769_v47, %v2430_v49  ;;  %v1343_v47 = vld [vmem:[#allocation3 + $0x6] ss:$16 sm:$0x3] }
 0x7f5   :  { %v1649_v53 = vmul.f32 -1.442695, %v2106_v52 }
 0x7f6   :  { %792 = vrot.lane.b32.xlu0 %v2107_v48, %s2262_s4 }
 0x7f7   :  { %2173 = vpow2.f32 %v1649_v53 }
 0x7fd   :  { %v2172_v54 = vpop.eup %2171 }
 0x7fe   :  { %v782_v55 = vadd.f32 1.0, %v2172_v54 }
 0x800   :  { %2175 = vrcp.f32 %v782_v55  ;;  %v835_v55 = vld [vmem:[#allocation7 + $0x18] sm:$0xff] }
 0x801   :  { %v2174_v56 = vpop.eup %2173 }
 0x802   :  { %v783_v58 = vadd.f32 1.0, %v2174_v56  ;;  %v1520_v56 = vld [vmem:[#allocation7 + $0x210] sm:$0xff] }
 0x804   :  { %2177 = vrcp.f32 %v783_v58  ;;  %v1521_v58 = vld [vmem:[#allocation7 + $0x218] sm:$0xff] }
 0x80a   :  { %v2508_v59 = vpop.eup %2175 }
 0x80b   :  { %v802_v25 = vsub.f32 1.0, %v2508_v59  ;;  %v814_v27 = vmul.f32 %v2508_v59, %v2489_v33  ;;  %v833_v33 = vld [vmem:[#allocation7 + $0x8] sm:$0xff] }
 0x80c   :  { %v1997_v50 = vpack.c.bf16 %v833_v33, %v832_v43  ;;  %v1174_v33 = vld [vmem:[#allocation7 + $0x100] sm:$0xff] }
 0x80e   :  { %v2511_v62 = vpop.eup %2177 }
 0x80f   :  { %v803_v32 = vsub.f32 1.0, %v2511_v62  ;;  %v815_v37 = vmul.f32 %v2511_v62, %v2493_v41 }
 0x864   :  { %v791_v60 = vpop.permute.xlu0 %790 }
 0x865   :  { %v796_v49 = vmul.f32 %v2508_v59, %v791_v60  ;;  %v2084_v60 = vpack.c.bf16 %v1521_v58, %v1520_v56  ;;  %v1181_v56 = vld [vmem:[#allocation7 + $0x138] sm:$0xff] }
 0x867   :  { %v798_v61 = vadd.f32 %v2105_v45, %v796_v49  ;;  %v1519_v45 = vld [vmem:[#allocation7 + $0x208] sm:$0xff]  ;;  %v836_v49 = vld [vmem:[#allocation7 + $0x20] sm:$0xff] }
 0x868   :  { %v793_v63 = vpop.permute.xlu0 %792  ;;  %v2081_v52 = vpack.c.bf16 %v1519_v45, %v1518_v44  ;;  %v1175_v44 = vld [vmem:[#allocation7 + $0x108] sm:$0xff] }
 0x869   :  { %2179 = vtanh.f32 %v798_v61  ;;  %v797_v57 = vmul.f32 %v2511_v62, %v793_v63  ;;  %v837_v61 = vld [vmem:[#allocation7 + $0x28] sm:$0xff]  ;;  %v1522_v62 = vld [vmem:[#allocation7 + $0x220] sm:$0xff] }
 0x86a   :  { %v1523_v63 = vld [vmem:[#allocation7 + $0x228] sm:$0xff] }
 0x86b   :  { %v799_v1 = vadd.f32 %v2107_v48, %v797_v57  ;;  %v834_v48 = vld [vmem:[#allocation7 + $0x10] sm:$0xff]  ;;  %v2003_v57 = vpack.c.bf16 %v837_v61, %v836_v49 }
 0x86c   :  { %v2000_v59 = vpack.c.bf16 %v835_v55, %v834_v48  ;;  %v1180_v55 = vld [vmem:[#allocation7 + $0x130] sm:$0xff] }
 0x86d   :  { %2181 = vtanh.f32 %v799_v1  ;;  %v2087_v1 = vpack.c.bf16 %v1523_v63, %v1522_v62  ;;  %v2042_v58 = vpack.c.bf16 %v1181_v56, %v1180_v55  ;;  %v1171_v61 = vld [vmem:[#allocation3 + $0x4] ss:$16 sm:$0x3] }
 0x873   :  { %v2180_v10 = vpop.eup %2179 }
 0x874   :  { %806 = vrot.lane.b32.xlu1 %v2180_v10, %s2262_s4  ;;  %v1515_v10 = vld [vmem:[#allocation3 + $0x8] ss:$16 sm:$0x3] }
 0x877   :  { %v2182_v36 = vpop.eup %2181 }
 0x878   :  { %808 = vrot.lane.b32.xlu0 %v2182_v36, %s2262_s4 }
 0x8e6   :  { %v807_v26 = vpop.permute.xlu1 %806 }
 0x8e7   :  { %v812_v30 = vmul.f32 %v807_v26, %v802_v25  ;;  %v999_v26 = vld [vmem:[#allocation3 + $0x2] ss:$16 sm:$0x3] }
 0x8e9   :  { %v816_v31 = vadd.f32 %v814_v27, %v812_v30  ;;  %v2021_v27 = vpack.c.bf16 %v1089_v24, %v1088_v23 }
 0x8ea   :  { %v809_v34 = vpop.permute.xlu0 %808 }
 0x8eb   :  { %v813_v38 = vmul.f32 %v809_v34, %v803_v32  ;;  %820 = vrot.lane.b32.xlu1 %v816_v31, %s2262_s4  ;;  %v1090_v31 = vld [vmem:[#allocation7 + $0xd0] sm:$0xff]  ;;  %v1091_v32 = vld [vmem:[#allocation7 + $0xd8] sm:$0xff] }
 0x8ec   :  { %v2024_v34 = vpack.c.bf16 %v1091_v32, %v1090_v31 }
 0x8ed   :  { %v817_v39 = vadd.f32 %v815_v37, %v813_v38  ;;  %v1092_v37 = vld [vmem:[#allocation7 + $0xe0] sm:$0xff]  ;;  %v1093_v38 = vld [vmem:[#allocation7 + $0xe8] sm:$0xff] }
 0x8ef   :  { %822 = vrot.lane.b32.xlu1 %v817_v39, %s2262_s4  ;;  %v2027_v39 = vpack.c.bf16 %v1093_v38, %v1092_v37 }
 0x95d   :  { %v821_v42 = vpop.permute.xlu1 %820 }
 0x95e   :  { %827 = vst.msk [vmem:[#allocation3 + $0x30] sm:$0xff] %vm257_vm1, %v821_v42  ;;  %v1094_v42 = vld [vmem:[#allocation7 + $0xf0] sm:$0xff] }
 0x961   :  { %v823_v15 = vpop.permute.xlu1 %822 }
 0x962   :  { %828 = vst.msk [vmem:[#allocation3 + $0x38] sm:$0xff] %vm257_vm1, %v823_v15  ;;  %v1095_v15 = vld [vmem:[#allocation7 + $0xf8] sm:$0xff] }
 0x963   :  { %v2030_v43 = vpack.c.bf16 %v1095_v15, %v1094_v42 }
 0x965   :  { %v842_v41 = vld [vmem:[#allocation3 + $0x1] ss:$16 sm:$0xc]  ;;  %v1344_v51 = vld [vmem:[#allocation3 + $0x6] ss:$16 sm:$0xc] }
 0x966   :  { %v843_v53 = vor.u32 %v842_v41, %v841_v46  ;;  %v1345_v54 = vor.u32 %v1344_v51, %v1343_v47  ;;  %v830_v9 = vld [vmem:[#allocation3] ss:$16 sm:$0xc]  ;;  %v1000_v25 = vld [vmem:[#allocation3 + $0x2] ss:$16 sm:$0xc]  ;;  %v2033_v47 = vpack.c.bf16 %v1175_v44, %v1174_v33 }
 0x967   :  { %v831_v36 = vor.u32 %v830_v9, %v829_v29  ;;  %v1001_v30 = vor.u32 %v1000_v25, %v999_v26  ;;  %v1086_v45 = vld [vmem:[#allocation3 + $0x3] ss:$16 sm:$0xc]  ;;  %v1172_v49 = vld [vmem:[#allocation3 + $0x4] ss:$16 sm:$0xc] }
 0x968   :  { %1758 = vmatmul.mubr.msk.f32.vlgmr.msra.gmra.mrb[0].mxu1 %vm257_vm1, %v843_v53  ;;  %1872 = vmatmul.mubr.msk.f32.vlgmr.msra.gmra.mrb[16].mxu0 %vm257_vm1, %v1345_v54  ;;  %v1085_v46 = vld [vmem:[#allocation3 + $0x3] ss:$16 sm:$0x3]  ;;  %v1179_v53 = vld [vmem:[#allocation7 + $0x128] sm:$0xff]  ;;  %v1173_v63 = vor.u32 %v1172_v49, %v1171_v61 }
 0x969   :  { %1998 = vmatpush3.bf16.msra.mxu1 %v1997_v50  ;;  %2082 = vmatpush3.bf16.msra.mxu0 %v2081_v52  ;;  %v1516_v28 = vld [vmem:[#allocation3 + $0x8] ss:$16 sm:$0xc]  ;;  %v1087_v48 = vor.u32 %v1086_v45, %v1085_v46  ;;  %v1176_v41 = vld [vmem:[#allocation7 + $0x110] sm:$0xff]  ;;  %v1178_v52 = vld [vmem:[#allocation7 + $0x120] sm:$0xff] }
 0x96a   :  { %1999 = vmatprep.subr.bf16.mxu1 %v2263_v5  ;;  %2083 = vmatprep.subr.bf16.mxu0 %v2263_v5  ;;  %v1517_v40 = vor.u32 %v1516_v28, %v1515_v10  ;;  %v1177_v50 = vld [vmem:[#allocation7 + $0x118] sm:$0xff]  ;;  %v2039_v54 = vpack.c.bf16 %v1179_v53, %v1178_v52  ;;  %v1433_v9 = vld [vmem:[#allocation7 + $0x1c8] sm:$0xff]  ;;  %v1258_v28 = vld [vmem:[#allocation3 + $0x5] ss:$16 sm:$0xc] }
 0x96b   :  { %1776 = vmatprep.mubr.msk.f32.mxu1 %vm2264_vm2, %v2261_v0  ;;  %1909 = vmatprep.mubr.msk.f32.mxu0 %vm2264_vm2, %v2261_v0  ;;  %v2036_v51 = vpack.c.bf16 %v1177_v50, %v1176_v41  ;;  %v1257_v29 = vld [vmem:[#allocation3 + $0x5] ss:$16 sm:$0x3]  ;;  %v2069_v10 = vpack.c.bf16 %v1433_v9, %v1432_v8  ;;  %v1430_v19 = vld [vmem:[#allocation3 + $0x7] ss:$16 sm:$0xc] }
 0x96c   :  { %v1659_v52 = vld [vmem:[%s2609_s5] ss:$0 sm:$0xff] }
 0x96d   :  { %2001 = vmatpush3.bf16.msra.mxu1 %v2000_v59  ;;  %2085 = vmatpush3.bf16.msra.mxu0 %v2084_v60  ;;  %v1260_v59 = vld [vmem:[#allocation7 + $0x140] sm:$0xff]  ;;  %v1261_v60 = vld [vmem:[#allocation7 + $0x148] sm:$0xff] }
 0x96e   :  { %2002 = vmatprep.subr.bf16.mxu1 %v2263_v5  ;;  %2086 = vmatprep.subr.bf16.mxu0 %v2263_v5  ;;  %v2045_v62 = vpack.c.bf16 %v1261_v60, %v1260_v59 }
 0x971   :  { %2004 = vmatpush3.bf16.msra.mxu1 %v2003_v57  ;;  %2088 = vmatpush3.bf16.msra.mxu0 %v2087_v1  ;;  %v1262_v57 = vld [vmem:[#allocation7 + $0x150] sm:$0xff]  ;;  %v1263_v1 = vld [vmem:[#allocation7 + $0x158] sm:$0xff] }
 0x972   :  { %2005 = vmatprep.subr.bf16.mxu1 %v2263_v5  ;;  %2089 = vmatprep.subr.bf16.mxu0 %v2263_v5  ;;  %v2048_v2 = vpack.c.bf16 %v1263_v1, %v1262_v57 }
 0x975   :  { %2007 = vmatpush3.bf16.msra.mxu1 %v2006_v21  ;;  %2091 = vmatpush3.bf16.msra.mxu0 %v2090_v7  ;;  %v1266_v21 = vld [vmem:[#allocation7 + $0x170] sm:$0xff]  ;;  %v1267_v7 = vld [vmem:[#allocation7 + $0x178] sm:$0xff] }
 0x976   :  { %2008 = vmatprep.subr.bf16.mxu1 %v2263_v5  ;;  %v2054_v22 = vpack.c.bf16 %v1267_v7, %v1266_v21 }
 0x978   :  { %1777 = vmatmul.mubr.msk.f32.vlgmr.msra.gmra.mrb[2].mxu1 %vm257_vm1, %v831_v36  ;;  %1910 = vmatmul.mubr.msk.f32.vlgmr.msra.gmra.mrb[18].mxu0 %vm257_vm1, %v1517_v40  ;;  %v1434_v36 = vld [vmem:[#allocation7 + $0x1d0] sm:$0xff]  ;;  %v1435_v40 = vld [vmem:[#allocation7 + $0x1d8] sm:$0xff] }
 0x979   :  { %2010 = vmatpush3.bf16.msra.mxu1 %v2009_v35  ;;  %1795 = vmatprep.mubr.msk.f32.mxu1 %vm2264_vm2, %v2261_v0  ;;  %v1259_v35 = vor.u32 %v1258_v28, %v1257_v29  ;;  %v2072_v11 = vpack.c.bf16 %v1435_v40, %v1434_v36 }
 0x97a   :  { %2011 = vmatprep.subr.bf16.mxu1 %v2263_v5 }
 0x97d   :  { %2013 = vmatpush3.bf16.msra.mxu1 %v2012_v13  ;;  %v1437_v13 = vld [vmem:[#allocation7 + $0x1e8] sm:$0xff] }
 0x97e   :  { %2014 = vmatprep.subr.bf16.mxu1 %v2263_v5  ;;  %v2075_v14 = vpack.c.bf16 %v1437_v13, %v1436_v12 }
 0x981   :  { %2016 = vmatpush3.bf16.msra.mxu1 %v2015_v17  ;;  %v1439_v17 = vld [vmem:[#allocation7 + $0x1f8] sm:$0xff] }
 0x982   :  { %2017 = vmatprep.subr.bf16.mxu1 %v2263_v5  ;;  %v2078_v18 = vpack.c.bf16 %v1439_v17, %v1438_v16 }
 0x985   :  { %2019 = vmatpush3.bf16.msra.mxu1 %v2018_v20  ;;  %v1429_v20 = vld [vmem:[#allocation3 + $0x7] ss:$16 sm:$0x3] }
 0x986   :  { %2020 = vmatprep.subr.bf16.mxu1 %v2263_v5  ;;  %v1431_v23 = vor.u32 %v1430_v19, %v1429_v20 }
 0x988   :  { %1796 = vmatmul.mubr.msk.f32.vlgmr.msra.gmra.mrb[4].mxu1 %vm257_vm1, %v1001_v30 }
 0x989   :  { %2022 = vmatpush3.bf16.msra.mxu1 %v2021_v27  ;;  %1814 = vmatprep.mubr.msk.f32.mxu1 %vm2264_vm2, %v2261_v0 }
 0x98a   :  { %2023 = vmatprep.subr.bf16.mxu1 %v2263_v5 }
 0x98d   :  { %2025 = vmatpush3.bf16.msra.mxu1 %v2024_v34 }
 0x98e   :  { %2026 = vmatprep.subr.bf16.mxu1 %v2263_v5 }
 0x991   :  { %2028 = vmatpush3.bf16.msra.mxu1 %v2027_v39 }
 0x992   :  { %2029 = vmatprep.subr.bf16.mxu1 %v2263_v5 }
 0x995   :  { %2031 = vmatpush3.bf16.msra.mxu1 %v2030_v43 }
 0x996   :  { %2032 = vmatprep.subr.bf16.mxu1 %v2263_v5 }
 0x998   :  { %1815 = vmatmul.mubr.msk.f32.vlgmr.msra.gmra.mrb[6].mxu1 %vm257_vm1, %v1087_v48 }
 0x999   :  { %2034 = vmatpush3.bf16.msra.mxu1 %v2033_v47  ;;  %1833 = vmatprep.mubr.msk.f32.mxu1 %vm2264_vm2, %v2261_v0 }
 0x99a   :  { %2035 = vmatprep.subr.bf16.mxu1 %v2263_v5 }
 0x99d   :  { %2037 = vmatpush3.bf16.msra.mxu1 %v2036_v51 }
 0x99e   :  { %2038 = vmatprep.subr.bf16.mxu1 %v2263_v5 }
 0x9a1   :  { %2040 = vmatpush3.bf16.msra.mxu1 %v2039_v54 }
 0x9a2   :  { %2041 = vmatprep.subr.bf16.mxu1 %v2263_v5 }
 0x9a5   :  { %2043 = vmatpush3.bf16.msra.mxu1 %v2042_v58 }
 0x9a6   :  { %2044 = vmatprep.subr.bf16.mxu1 %v2263_v5 }
 0x9a8   :  { %1834 = vmatmul.mubr.msk.f32.vlgmr.msra.gmra.mrb[8].mxu1 %vm257_vm1, %v1173_v63 }
 0x9a9   :  { %2046 = vmatpush3.bf16.msra.mxu1 %v2045_v62  ;;  %1852 = vmatprep.mubr.msk.f32.mxu1 %vm2264_vm2, %v2261_v0 }
 0x9aa   :  { %2047 = vmatprep.subr.bf16.mxu1 %v2263_v5 }
 0x9ad   :  { %2049 = vmatpush3.bf16.msra.mxu1 %v2048_v2 }
 0x9ae   :  { %2050 = vmatprep.subr.bf16.mxu1 %v2263_v5 }
 0x9b1   :  { %2052 = vmatpush3.bf16.msra.mxu1 %v2051_v6 }
 0x9b2   :  { %2053 = vmatprep.subr.bf16.mxu1 %v2263_v5 }
 0x9b5   :  { %2055 = vmatpush3.bf16.msra.mxu1 %v2054_v22 }
 0x9b6   :  { %2068 = vmatprep.subr.bf16.mxu1 %v2263_v5 }
 0x9b8   :  { %1853 = vmatmul.mubr.msk.f32.vlgmr.msra.gmra.mrb[10].mxu1 %vm257_vm1, %v1259_v35 }
 0x9b9   :  { %2070 = vmatpush3.bf16.msra.mxu1 %v2069_v10  ;;  %1890 = vmatprep.mubr.msk.f32.mxu1 %vm2264_vm2, %v2261_v0 }
 0x9ba   :  { %2071 = vmatprep.subr.bf16.mxu1 %v2263_v5 }
 0x9bd   :  { %2073 = vmatpush3.bf16.msra.mxu1 %v2072_v11 }
 0x9be   :  { %2074 = vmatprep.subr.bf16.mxu1 %v2263_v5 }
 0x9c1   :  { %2076 = vmatpush3.bf16.msra.mxu1 %v2075_v14 }
 0x9c2   :  { %2077 = vmatprep.subr.bf16.mxu1 %v2263_v5 }
 0x9c5   :  { %2079 = vmatpush3.bf16.msra.mxu1 %v2078_v18 }
 0x9c8   :  { %1891 = vmatmul.mubr.msk.f32.vlgmr.msra.gmra.mrb[12].mxu1 %vm257_vm1, %v1431_v23 }
 0xa3b   :  { %v921_v0 = vpop.f32.mrb[0].mxu1  ;;  %v1423_v24 = vpop.f32.mrb[16].mxu0 }
 0xa3c   :  { %v1759_v25 = vpop.f32.mrb[1].mxu1  ;;  %v1873_v26 = vpop.f32.mrb[17].mxu0 }
 0xa4b   :  { %v994_v27 = vpop.f32.mrb[2].mxu1  ;;  %v1595_v30 = vpop.f32.mrb[18].mxu0 }
 0xa4c   :  { %v995_v31 = vadd.f32 %v994_v27, %v921_v0  ;;  %v1778_v32 = vpop.f32.mrb[3].mxu1  ;;  %v1911_v34 = vpop.f32.mrb[19].mxu0 }
 0xa5b   :  { %v1079_v37 = vpop.f32.mrb[4].mxu1 }
 0xa5c   :  { %v1083_v38 = vadd.f32 %v1079_v37, %v995_v31  ;;  %v1797_v39 = vpop.f32.mrb[5].mxu1 }
 0xa6b   :  { %v1165_v42 = vpop.f32.mrb[6].mxu1 }
 0xa6c   :  { %v1169_v5 = vadd.f32 %v1165_v42, %v1083_v38  ;;  %v1816_v15 = vpop.f32.mrb[7].mxu1 }
 0xa7b   :  { %v1251_v43 = vpop.f32.mrb[8].mxu1 }
 0xa7c   :  { %v1255_v33 = vadd.f32 %v1251_v43, %v1169_v5  ;;  %v1835_v44 = vpop.f32.mrb[9].mxu1 }
 0xa8b   :  { %v1337_v45 = vpop.f32.mrb[10].mxu1 }
 0xa8c   :  { %v1341_v46 = vadd.f32 %v1337_v45, %v1255_v33  ;;  %v1854_v47 = vpop.f32.mrb[11].mxu1 }
 0xa8e   :  { %v1427_v48 = vadd.f32 %v1423_v24, %v1341_v46 }
 0xa9b   :  { %v1509_v41 = vpop.f32.mrb[12].mxu1 }
 0xa9c   :  { %v1513_v50 = vadd.f32 %v1509_v41, %v1427_v48  ;;  %v1892_v51 = vpop.f32.mrb[13].mxu1 }
 0xa9e   :  { %v1599_v53 = vadd.f32 %v1595_v30, %v1513_v50 }
 0xaa0   :  { %v1607_v54 = vadd.f32 %v1659_v52, %v1599_v53 }
 0xaa2   :  { %1608 = vst [vmem:[#allocation9] sm:$0xf] %v1607_v54 }
 0xaa3   :  { %2238 = shalt.err (!%p2235_p6)
}
 0xaa4   :  { %s2239_s12 = scalar_lea.hbm %s2610_s6, 64 }
 0xaa5   :  { %p2240_p7 = scmp.ne.s32.totalorder %s2610_s6, %s2239_s12  ;;  %p2243_p8 = scmp.lt.u32.totalorder %s2239_s12, %s2610_s6 }
 0xaa7   :  { %p2245_p9 = pnand %p2243_p8, %p2240_p7 }
 0xaa9   :  { %2248 = shalt.err (!%p2245_p9)
}
 0xaaa   :  { %1618 = dma.vmem_to_hbm [thread:$0]  %s1616_s8, 64, %s2610_s6, [#allocation6]  }
 0xaab   :  { %2253 = dma.done.wait [#allocation6], 64  }
 0xaac   :  { %2254 = vsyncadd [#allocation6], 4294967232 }
 0xaad   :  { %1622 = vsyncpa [#allocation5], 1 }
 0xaae   :  { %1623 = vsyncpa [#allocation8], 1 }
 0xaaf   :  { %1624 = vsyncpa [#allocation6], 1 }

</bundles_post_ra>
